<compile_context>
chip_gen: v5e
topology: v5e:2x2
jax: 0.10.0
libtpu: 0.0.40
codegen_flags: <defaults>
</compile_context>

<pallas_src>
import jax
import jax.numpy as jnp
from jax.experimental import pallas as pl
from jax.experimental.pallas import tpu as pltpu


def _round_up(x: int, m: int) -> int:
    return ((x + m - 1) // m) * m


# ----------------------------------------------------------------------------
# Pallas kernel: fused patch-embed matmul + bias (one M-tile per grid step)
# ----------------------------------------------------------------------------
def _patch_embed_kernel(x_ref, w_ref, b_ref, o_ref):
    # x_ref: (TM, K) bf16, w_ref: (K, D) bf16, b_ref: (1, D) f32, o_ref: (TM, D) f32
    acc = jnp.dot(x_ref[...], w_ref[...], preferred_element_type=jnp.float32)
    o_ref[...] = (acc + b_ref[...]).astype(o_ref.dtype)


def patch_embed_matmul(patches: jax.Array, weight: jax.Array, bias: jax.Array,
                       *, tm: int = 512) -> jax.Array:
    """patches: (M, K), weight: (K, D), bias: (D,) -> (M, D) f32.

    Tiles M with a grid (auto double-buffering), keeps weight/bias resident,
    pads K/D to 128 multiples, feeds the MXU bf16 with f32 accumulation.
    """
    M, K = patches.shape
    Kw, D = weight.shape
    assert K == Kw, (K, Kw)

    # Pad contraction / output feature dims to full lanes / full MXU columns.
    K_pad = _round_up(K, 128)
    D_pad = _round_up(D, 128)
    # Tile M; keep the tile sublane-aligned and pad M to a tile multiple.
    tm_eff = min(tm, _round_up(M, 8))
    M_pad = _round_up(M, tm_eff)

    x = patches
    if (M_pad, K_pad) != (M, K):
        x = jnp.pad(x, ((0, M_pad - M), (0, K_pad - K)))
    w = weight
    if (K_pad, D_pad) != (K, D):
        w = jnp.pad(w, ((0, K_pad - K), (0, D_pad - D)))
    b2 = bias.reshape(1, D).astype(jnp.float32)
    if D_pad != D:
        b2 = jnp.pad(b2, ((0, 0), (0, D_pad - D)))

    # bf16 inputs: halves HBM traffic and hits native MXU rate; f32 accumulate.
    x = x.astype(jnp.bfloat16)
    w = w.astype(jnp.bfloat16)

    grid = (M_pad // tm_eff,)

    # Scheduling hint for XLA around the custom call.
    cost = pl.CostEstimate(
        flops=2 * M_pad * K_pad * D_pad,
        transcendentals=0,
        bytes_accessed=(M_pad * K_pad * 2 + K_pad * D_pad * 2
                        + D_pad * 4 + M_pad * D_pad * 4),
    )

    # VMEM budget: double-buffered x/out tiles + resident weight/bias (+margin).
    vmem_needed = 2 * (tm_eff * K_pad * 2 + tm_eff * D_pad * 4) \
        + 2 * (K_pad * D_pad * 2 + D_pad * 4)
    vmem_limit = int(min(max(2 * vmem_needed, 16 << 20), 60 << 20))

    out = pl.pallas_call(
        _patch_embed_kernel,
        out_shape=jax.ShapeDtypeStruct((M_pad, D_pad), jnp.float32),
        grid=grid,
        in_specs=[
            pl.BlockSpec((tm_eff, K_pad), lambda i: (i, 0)),   # x: new tile per step
            pl.BlockSpec((K_pad, D_pad), lambda i: (0, 0)),    # weight: resident
            pl.BlockSpec((1, D_pad), lambda i: (0, 0)),        # bias: resident
        ],
        out_specs=pl.BlockSpec((tm_eff, D_pad), lambda i: (i, 0)),
        compiler_params=pltpu.CompilerParams(
            dimension_semantics=("parallel",),  # megacore-shardable on v7x
            vmem_limit_bytes=vmem_limit,
        ),
        cost_estimate=cost,
    )(x, w, b2)

    if (M_pad, D_pad) != (M, D):
        out = out[:M, :D]
    return out


# ----------------------------------------------------------------------------
# Encoder (JAX/Pallas analogue of pangaea.encoders.base.Encoder)
# ----------------------------------------------------------------------------
class PallasEncoder:
    def __init__(
        self,
        model_name: str,
        input_bands: dict[str, list[str]],
        input_size: int,
        embed_dim: int,
        output_layers: list[int],
        output_dim,
        multi_temporal: bool,
        multi_temporal_output: bool,
        pyramid_output: bool,
        encoder_weights: str = "",
        download_url: str = "",
        patch_size: int = 4,
        seed: int = 0,
    ):
        self.model_name = model_name
        self.input_bands = input_bands
        self.input_size = input_size
        self.embed_dim = embed_dim
        self.output_layers = output_layers
        self.output_dim = (
            [output_dim for _ in output_layers]
            if isinstance(output_dim, int)
            else list(output_dim)
        )
        self.encoder_weights = encoder_weights
        self.multi_temporal = multi_temporal
        self.multi_temporal_output = multi_temporal_output
        self.pyramid_output = pyramid_output
        self.download_url = download_url  # I/O not translated (no download)
        self.patch_size = patch_size

        # Deterministic per-modality patch-embedding weights:
        # conv weight (embed_dim, C, P, P) and bias (embed_dim,), as torch Conv2d.
        self.params = {}
        key = jax.random.PRNGKey(seed)
        for modality, bands in input_bands.items():
            c = len(bands)
            key, kw, kb = jax.random.split(key, 3)
            fan_in = c * patch_size * patch_size
            w = jax.random.normal(kw, (embed_dim, c, patch_size, patch_size), jnp.float32)
            w = w * (1.0 / jnp.sqrt(fan_in))
            b = jax.random.normal(kb, (embed_dim,), jnp.float32) * 0.01
            self.params[modality] = (w, b)

    def forward(self, x: dict[str, jax.Array]) -> list[jax.Array]:
        """x: {modality: (B, C, H, W)} -> list of (B, embed_dim, H', W')."""
        P = self.patch_size
        D = self.embed_dim

        modalities = list(x.keys())
        B, _, H, W = x[modalities[0]].shape
        Hp, Wp = H // P, W // P
        M = B * Hp * Wp

        # Fuse all modalities into ONE matmul by concatenating along K:
        #   sum_m(patches_m @ W_m + b_m) == concat_K(patches_m) @ concat_K(W_m) + sum_m(b_m)
        patch_pieces, w_pieces = [], []
        bias_total = jnp.zeros((D,), jnp.float32)
        for modality in modalities:
            xm = x[modality]
            w, b = self.params[modality]
            Bm, C, Hm, Wm = xm.shape
            assert (Bm, Hm, Wm) == (B, H, W), "all modalities must share (B, H, W)"

            # Patchify NCHW -> (B*Hp*Wp, C*P*P)  [layout plumbing outside kernel]
            # TODO(synk): fold this gather into the kernel via a (B,Hp,Wp) grid
            # with Element blocks to avoid the extra HBM pass for huge inputs.
            patches = (
                xm.reshape(B, C, Hp, P, Wp, P)
                .transpose(0, 2, 4, 1, 3, 5)
                .reshape(M, C * P * P)
            )
            patch_pieces.append(patches)
            w_pieces.append(w.reshape(D, C * P * P).T)  # (C*P*P, D)
            bias_total = bias_total + b

        patches_all = (
            patch_pieces[0] if len(patch_pieces) == 1
            else jnp.concatenate(patch_pieces, axis=1)
        )
        w_all = (
            w_pieces[0] if len(w_pieces) == 1
            else jnp.concatenate(w_pieces, axis=0)
        )

        # Hot path: single tiled Pallas matmul + bias (bf16 in, f32 accumulate).
        out = patch_embed_matmul(patches_all, w_all, bias_total)  # (M, D) f32

        # Back to the PyTorch contract (B, embed_dim, H', W').
        # TODO(synk): keep NHWC (D last, lane-dense) if downstream tolerates it
        # to avoid this extra HBM transpose pass.
        out = out.reshape(B, Hp, Wp, D).transpose(0, 3, 1, 2)

        # One output per requested layer (single-stem encoder -> same feature map).
        return [out for _ in self.output_layers]

    __call__ = forward


# ----------------------------------------------------------------------------
# Demo / self-test
# ----------------------------------------------------------------------------
if __name__ == "__main__":
    key = jax.random.PRNGKey(0)
    B, C, H, W = 2, 4, 16, 16
    embed_dim = 32
    patch = 4

    encoder = PallasEncoder(
        model_name="pallas_base_encoder",
        input_bands={"optical": ["B1", "B2", "B3", "B4"]},
        input_size=H,
        embed_dim=embed_dim,
        output_layers=[3, 5, 7, 11],
        output_dim=embed_dim,
        multi_temporal=False,
        multi_temporal_output=False,
        pyramid_output=False,
        encoder_weights="",
        download_url="",
        patch_size=patch,
        seed=0,
    )

    x_opt = jax.random.normal(key, (B, C, H, W), jnp.float32)
    outs = encoder({"optical": x_opt})
    outs = [jax.block_until_ready(o) for o in outs]

    # Reference check (bf16-rounded inputs, f32 accumulate — matches MXU path).
    w, b = encoder.params["optical"]
    Hp, Wp = H // patch, W // patch
    patches_ref = (
        x_opt.reshape(B, C, Hp, patch, Wp, patch)
        .transpose(0, 2, 4, 1, 3, 5)
        .reshape(B * Hp * Wp, C * patch * patch)
    )
    p_bf = patches_ref.astype(jnp.bfloat16).astype(jnp.float32)
    w_bf = w.reshape(embed_dim, -1).T.astype(jnp.bfloat16).astype(jnp.float32)
    ref = (p_bf @ w_bf + b).reshape(B, Hp, Wp, embed_dim).transpose(0, 3, 1, 2)

    assert len(outs) == len(encoder.output_layers)
    assert outs[0].shape == (B, embed_dim, Hp, Wp)
    assert jnp.allclose(outs[0], ref, atol=2e-3, rtol=2e-3), (
        float(jnp.max(jnp.abs(outs[0] - ref)))
    )

    print("KERNEL_OK")
</pallas_src>

<mosaic_0001>
module attributes {stable_mosaic.version = 11 : i64} {
  func.func @_patch_embed_kernel(%arg0: i32, %arg1: memref<32x128xbf16, #tpu.memory_space<vmem>>, %arg2: memref<128x128xbf16, #tpu.memory_space<vmem>>, %arg3: memref<1x128xf32, #tpu.memory_space<vmem>>, %arg4: memref<32x128xf32, #tpu.memory_space<vmem>>) attributes {dimension_semantics = [#tpu.dimension_semantics<parallel>], iteration_bounds = array<i64: 1>, scalar_prefetch = 0 : i64, scratch_operands = 0 : i64, tpu.core_type = #tpu.core_type<tc>, window_params = [{transform_indices = @transform_0, window_bounds = array<i64: 32, 128>}, {pipeline_mode = #tpu.pipeline_mode<synchronous>, transform_indices = @transform_1, window_bounds = array<i64: 128, 128>}, {pipeline_mode = #tpu.pipeline_mode<synchronous>, transform_indices = @transform_2, window_bounds = array<i64: 1, 128>}, {transform_indices = @transform_3, window_bounds = array<i64: 32, 128>}]} {
    %c0 = arith.constant 0 : index
    %c0_0 = arith.constant 0 : index
    %0 = vector.load %arg1[%c0, %c0_0] : memref<32x128xbf16, #tpu.memory_space<vmem>>, vector<32x128xbf16>
    %c0_1 = arith.constant 0 : index
    %c0_2 = arith.constant 0 : index
    %1 = vector.load %arg2[%c0_1, %c0_2] : memref<128x128xbf16, #tpu.memory_space<vmem>>, vector<128x128xbf16>
    %cst = arith.constant dense<0.000000e+00> : vector<32x128xf32>
    %2 = tpu.matmul %0, %1, %cst {dimension_numbers = #tpu.dot_dimension_numbers<[1], [0], [0], [1], [0, 0, 1, 1], [], []>} : vector<32x128xbf16>, vector<128x128xbf16>, vector<32x128xf32> -> vector<32x128xf32>
    %c0_3 = arith.constant 0 : index
    %c0_4 = arith.constant 0 : index
    %3 = vector.load %arg3[%c0_3, %c0_4] : memref<1x128xf32, #tpu.memory_space<vmem>>, vector<1x128xf32>
    %4 = vector.broadcast %3 : vector<1x128xf32> to vector<32x128xf32>
    %5 = arith.addf %2, %4 : vector<32x128xf32>
    %c0_5 = arith.constant 0 : index
    %c0_6 = arith.constant 0 : index
    %6 = vector.load %arg4[%c0_5, %c0_6] : memref<32x128xf32, #tpu.memory_space<vmem>>, vector<32x128xf32>
    tpu.vector_store %arg4[%c0_5, %c0_6], %5 {strides = array<i32>} : memref<32x128xf32, #tpu.memory_space<vmem>>, vector<32x128xf32>,
    return
  }
  func.func @transform_0(%arg0: i32) -> (i32, i32) {
    %c0_i32 = arith.constant 0 : i32
    %c0_i32_0 = arith.constant 0 : i32
    return %arg0, %c0_i32 : i32, i32
  }
  func.func @transform_1(%arg0: i32) -> (i32, i32) {
    %c0_i32 = arith.constant 0 : i32
    %c0_i32_0 = arith.constant 0 : i32
    %c0_i32_1 = arith.constant 0 : i32
    return %c0_i32, %c0_i32_0 : i32, i32
  }
  func.func @transform_2(%arg0: i32) -> (i32, i32) {
    %c0_i32 = arith.constant 0 : i32
    %c0_i32_0 = arith.constant 0 : i32
    %c0_i32_1 = arith.constant 0 : i32
    return %c0_i32, %c0_i32_0 : i32, i32
  }
  func.func @transform_3(%arg0: i32) -> (i32, i32) {
    %c0_i32 = arith.constant 0 : i32
    %c0_i32_0 = arith.constant 0 : i32
    return %arg0, %c0_i32 : i32, i32
  }
}

</mosaic_0001>

<bundles_post_ra>
// kernel: tpu_custom_call.1
= control target key start
LH: loop header
LB: loop body
LE: loop exit
PB: predicated region body
PF: predicated region fallthrough
CT: control target
= control target key end

     0   :  { %8 = vsyncpa [#allocation3], 0  ;;  %s357_s0 = inlined_call_operand.hbm [shape: bf16[32,128], index: 0, kind: input, shape index: {}]   ;;  %s358_s1 = inlined_call_operand.hbm [shape: bf16[128,128], index: 1, kind: input, shape index: {}]   ;;  %s359_s2 = inlined_call_operand.vmem [shape: f32[1,128], index: 2, kind: input, shape index: {}]   ;;  %s360_s3 = inlined_call_operand.hbm [shape: f32[32,128], index: 3, kind: output, shape index: {}]  }
   0x1   :  { %9 = vsyncpa [#allocation6], 0 }
   0x2   :  { %10 = vsyncpa [#allocation4], 0  ;;  %s15_s14 = sshll.u32 %s357_s0, 4  ;;  %s318_s15 = smov [#allocation2]   ;;  %s16_s14 = int_to_ptr.hbm [resolvable:$true] %s15_s14 }
   0x3   :  { %s17_s16 = sshll.u32 %s318_s15, 4  ;;  %s28_s19 = sshll.u32 %s358_s1, 4  ;;  %s18_s16 = int_to_ptr.vmem [resolvable:$true] %s17_s16  ;;  %s29_s19 = int_to_ptr.hbm [resolvable:$true] %s28_s19 }
   0x4   :  { %s319_s20 = smov 64   ;;  %s320_s21 = smov 4  }
   0x5   :  { %23 = dma.hbm_to_vmem [thread:$0]  %s16_s14, 256, %s18_s16, [#allocation3], %s319_s20, %s319_s20, %s320_s21  }
   0x6   :  { %s321_s22 = smov [#allocation5]  }
   0x7   :  { %s30_s23 = sshll.u32 %s321_s22, 4  ;;  %s31_s23 = int_to_ptr.vmem [resolvable:$true] %s30_s23 }
   0x8   :  { %36 = dma.hbm_to_vmem [thread:$0]  %s29_s19, 1024, %s31_s23, [#allocation6], %s319_s20, %s319_s20, %s320_s21  }
   0x9   :  { %312 = dma.done.wait [#allocation3], 256  }
   0xa   :  { %313 = vsyncadd [#allocation3], 4294967040 }
   0xb   :  { %314 = dma.done.wait [#allocation6], 1024  }
   0xc   :  { %315 = vsyncadd [#allocation6], 4294966272  ;;  %v223_v0 = vld [vmem:[#allocation5 + $0x38] sm:$0xff]  ;;  %v222_v1 = vld [vmem:[#allocation5 + $0x30] sm:$0xff]  ;;  %s322_s24 = smov [#allocation7]   ;;  %s160_s28 = sshll.u32 %s360_s3, 4  ;;  %s161_s28 = int_to_ptr.hbm [resolvable:$true] %s160_s28 }
   0xd   :  { %131 = vmatpush.bf16.msra.mxu0 %v223_v0  ;;  %224 = vmatpush.bf16.msra.mxu1 %v223_v0  ;;  %v221_v2 = vld [vmem:[#allocation5 + $0x28] sm:$0xff]  ;;  %v220_v3 = vld [vmem:[#allocation5 + $0x20] sm:$0xff]  ;;  %v219_v4 = vld [vmem:[#allocation5 + $0x18] sm:$0xff]  ;;  %s158_s25 = sshll.u32 %s322_s24, 4  ;;  %s324_s29 = smov 8   ;;  %s159_s25 = int_to_ptr.vmem [resolvable:$true] %s158_s25 }
   0xe   :  { %v218_v5 = vld [vmem:[#allocation5 + $0x10] sm:$0xff]  ;;  %v217_v6 = vld [vmem:[#allocation5 + $0x8] sm:$0xff]  ;;  %v216_v7 = vld [vmem:[#allocation5] sm:$0xff] }
   0xf   :  { %v214_v8 = vld [vmem:[#allocation2] sm:$0xff]  ;;  %v215_v9 = vld [vmem:[#allocation2 + $0x8] sm:$0xff] }
  0x10   :  { %v239_v10 = vld [vmem:[%s359_s2] ss:$0 sm:$0xff]  ;;  %s323_s2 = smov 128  }
  0x11   :  { %132 = vmatpush.bf16.msra.mxu0 %v222_v1  ;;  %225 = vmatpush.bf16.msra.mxu1 %v222_v1 }
  0x15   :  { %133 = vmatpush.bf16.msra.mxu0 %v221_v2  ;;  %226 = vmatpush.bf16.msra.mxu1 %v221_v2 }
  0x19   :  { %134 = vmatpush.bf16.msra.mxu0 %v220_v3  ;;  %227 = vmatpush.bf16.msra.mxu1 %v220_v3 }
  0x1d   :  { %135 = vmatpush.bf16.msra.mxu0 %v219_v4  ;;  %228 = vmatpush.bf16.msra.mxu1 %v219_v4 }
  0x21   :  { %136 = vmatpush.bf16.msra.mxu0 %v218_v5  ;;  %229 = vmatpush.bf16.msra.mxu1 %v218_v5 }
  0x25   :  { %137 = vmatpush.bf16.msra.mxu0 %v217_v6  ;;  %230 = vmatpush.bf16.msra.mxu1 %v217_v6 }
  0x29   :  { %138 = vmatpush.bf16.msra.mxu0 %v216_v7  ;;  %231 = vmatpush.bf16.msra.mxu1 %v216_v7 }
  0x2c   :  { %139 = vmatmul.bf16.vlgmr.msra.gmra.mxu0 %v214_v8  ;;  %144 = vmatmul.bf16.vlgmr.msra.gmra.mxu1 %v215_v9 }
  0xa9   :  { %v140_v11 = vpop.f32.mrf.mxu0  ;;  %v145_v12 = vpop.f32.mrf.mxu1 }
  0xaa   :  { %v141_v13 = vadd.f32 %v239_v10, %v140_v11  ;;  %v146_v14 = vadd.f32 %v239_v10, %v145_v12 }
  0xac   :  { %150 = vst [vmem:[#allocation7] sm:$0xff] %v141_v13 }
  0xad   :  { %152 = vst [vmem:[#allocation7 + $0x10] sm:$0xff] %v146_v14 }
  0xb1   :  { %v142_v15 = vpop.f32.mrf.mxu0  ;;  %v147_v16 = vpop.f32.mrf.mxu1 }
  0xb2   :  { %v143_v17 = vadd.f32 %v239_v10, %v142_v15  ;;  %v148_v18 = vadd.f32 %v239_v10, %v147_v16 }
  0xb4   :  { %151 = vst [vmem:[#allocation7 + $0x8] sm:$0xff] %v143_v17 }
  0xb5   :  { %153 = vst [vmem:[#allocation7 + $0x18] sm:$0xff] %v148_v18 }
  0xb6   :  { %166 = dma.vmem_to_hbm [thread:$0]  %s159_s25, 512, %s161_s28, [#allocation4], %s323_s2, %s323_s2, %s324_s29  }
  0xb7   :  { %316 = dma.done.wait [#allocation4], 512  }
  0xb8   :  { %317 = vsyncadd [#allocation4], 4294966784 }
  0xb9   :  { %171 = vsyncpa [#allocation3], 1 }
  0xba   :  { %172 = vsyncpa [#allocation6], 1 }
  0xbb   :  { %173 = vsyncpa [#allocation4], 1 }

</bundles_post_ra>
